<compile_context>
chip_gen: v7x
topology: tpu7x:2x2x1
jax: 0.10.0
libtpu: 0.0.40
codegen_flags: <defaults>
</compile_context>

<pallas_src>
import functools

import jax
import jax.numpy as jnp
from jax import lax
from jax.experimental import pallas as pl
from jax.experimental.pallas import tpu as pltpu

IN_F, H1, H2, OUT_F = 41, 25, 10, 2
_LANE = 128


def _round_up(n, m):
    return ((n + m - 1) // m) * m


def _mlp_kernel(x_ref, w1_ref, b1_ref, w2_ref, b2_ref, w3_ref, b3_ref, o_ref):
    """Fused 3-layer MLP for one batch tile; batch lives on the lane axis."""
    x = x_ref[...]                                             # (tb, 41)
    # Layer 1: W1 @ x^T -> (25, tb). Both operands contract on their lane
    # axis (trans_b form); lowers via the MXU transposed-operand path rather
    # than a materialized XLU transpose of the big x tile.
    h = lax.dot_general(w1_ref[...], x, (((1,), (1,)), ((), ())),
                        preferred_element_type=jnp.float32)
    h = jnp.maximum(h + b1_ref[...], 0.0)                      # ReLU1, (25, tb)
    h = jnp.dot(w2_ref[...], h, preferred_element_type=jnp.float32)
    h = jnp.maximum(h + b2_ref[...], 0.0)                      # ReLU2, (10, tb)
    y = jnp.dot(w3_ref[...], h, preferred_element_type=jnp.float32) + b3_ref[...]
    o_ref[...] = y.astype(o_ref.dtype)                         # (2, tb) lane-dense


@functools.partial(jax.jit, static_argnames=("tb",))
def mlp_forward(x, w1, b1, w2, b2, w3, b3, *, tb=8192):
    """x: (B, 41). Weights in PyTorch (out, in) layout, biases 1-D (out,)."""
    B = x.shape[0]
    x = x.astype(jnp.float32)                 # no-op when already f32

    # ---- batch-tile selection (static Python on shapes) --------------------
    tb_eff = min(tb, _round_up(B, _LANE))
    if B > 2 * _LANE:
        # Keep the grid at >= 2 steps so ("parallel",) can shard the batch
        # across both TensorCores on v7x megacore (and keeps tiles balanced).
        tb_eff = min(tb_eff, _round_up(-(-B // 2), _LANE))
    tb_eff = _round_up(tb_eff, _LANE)
    if tb_eff >= B:
        tb_eff = B                            # one full-array block (small B)
    grid = (pl.cdiv(B, tb_eff),)              # ragged tail -> partial last block

    # Biases as (out, 1) columns so they broadcast over the lane (batch) axis.
    b1c = b1.astype(jnp.float32).reshape(H1, 1)
    b2c = b2.astype(jnp.float32).reshape(H2, 1)
    b3c = b3.astype(jnp.float32).reshape(OUT_F, 1)

    rep = lambda shape: pl.BlockSpec(shape, lambda i: (0, 0))  # replicated param

    out_t = pl.pallas_call(
        _mlp_kernel,
        out_shape=jax.ShapeDtypeStruct((OUT_F, B), jnp.float32),
        grid=grid,
        in_specs=[
            pl.BlockSpec((tb_eff, IN_F), lambda i: (i, 0)),    # x batch tile
            rep((H1, IN_F)),   rep((H1, 1)),
            rep((H2, H1)),     rep((H2, 1)),
            rep((OUT_F, H2)),  rep((OUT_F, 1)),
        ],
        out_specs=pl.BlockSpec((OUT_F, tb_eff), lambda i: (0, i)),
        compiler_params=pltpu.CompilerParams(
            dimension_semantics=("parallel",),
            vmem_limit_bytes=48 * 1024 * 1024),
    )(x,
      w1.astype(jnp.float32), b1c,
      w2.astype(jnp.float32), b2c,
      w3.astype(jnp.float32), b3c)

    # Tiny (2, B) -> (B, 2) transpose; negligible vs the 164 B/row of input.
    return out_t.T


def _init_linear(key, fan_in, fan_out):
    """Deterministic PyTorch-style init: U(-1/sqrt(fan_in), 1/sqrt(fan_in))."""
    kw, kb = jax.random.split(key)
    bound = 1.0 / jnp.sqrt(fan_in)
    w = jax.random.uniform(kw, (fan_out, fan_in), jnp.float32, -bound, bound)
    b = jax.random.uniform(kb, (fan_out,), jnp.float32, -bound, bound)
    return w, b


def _reference(x, params):
    (w1, b1), (w2, b2), (w3, b3) = params
    h = jnp.maximum(x @ w1.T + b1, 0.0)
    h = jnp.maximum(h @ w2.T + b2, 0.0)
    return h @ w3.T + b3


if __name__ == "__main__":
    key = jax.random.PRNGKey(0)
    kx, k1, k2, k3, kx2 = jax.random.split(key, 5)

    w1, b1 = _init_linear(k1, IN_F, H1)
    w2, b2 = _init_linear(k2, H1, H2)
    w3, b3 = _init_linear(k3, H2, OUT_F)
    params = ((w1, b1), (w2, b2), (w3, b3))

    # Case 1: small batch -> single full-array block, 1-step grid.
    B = 16
    x = jax.random.normal(kx, (B, IN_F), jnp.float32)
    out = jax.block_until_ready(mlp_forward(x, w1, b1, w2, b2, w3, b3))
    ref = _reference(x, params)
    assert out.shape == (B, OUT_F)
    assert jnp.allclose(out, ref, atol=1e-5, rtol=1e-5), "mismatch (small batch)"

    # Case 2: ragged multi-tile batch -> partial last block, no jnp.pad copy.
    B2 = 300
    x2 = jax.random.normal(kx2, (B2, IN_F), jnp.float32)
    out2 = jax.block_until_ready(mlp_forward(x2, w1, b1, w2, b2, w3, b3, tb=128))
    ref2 = _reference(x2, params)
    assert out2.shape == (B2, OUT_F)
    assert jnp.allclose(out2, ref2, atol=1e-5, rtol=1e-5), "mismatch (ragged batch)"

    print("KERNEL_OK")
</pallas_src>

<mosaic_0001>
module attributes {stable_mosaic.version = 11 : i64} {
  func.func @_mlp_kernel(%arg0: i32, %arg1: memref<16x41xf32, #tpu.memory_space<vmem>>, %arg2: memref<25x41xf32, #tpu.memory_space<vmem>>, %arg3: memref<25x1xf32, #tpu.memory_space<vmem>>, %arg4: memref<10x25xf32, #tpu.memory_space<vmem>>, %arg5: memref<10x1xf32, #tpu.memory_space<vmem>>, %arg6: memref<2x10xf32, #tpu.memory_space<vmem>>, %arg7: memref<2x1xf32, #tpu.memory_space<vmem>>, %arg8: memref<2x16xf32, #tpu.memory_space<vmem>>) attributes {dimension_semantics = [#tpu.dimension_semantics<parallel>], iteration_bounds = array<i64: 1>, scalar_prefetch = 0 : i64, scratch_operands = 0 : i64, tpu.core_type = #tpu.core_type<tc>, window_params = [{transform_indices = @transform_0, window_bounds = array<i64: 16, 41>}, {pipeline_mode = #tpu.pipeline_mode<synchronous>, transform_indices = @transform_1, window_bounds = array<i64: 25, 41>}, {pipeline_mode = #tpu.pipeline_mode<synchronous>, transform_indices = @transform_2, window_bounds = array<i64: 25, 1>}, {pipeline_mode = #tpu.pipeline_mode<synchronous>, transform_indices = @transform_3, window_bounds = array<i64: 10, 25>}, {pipeline_mode = #tpu.pipeline_mode<synchronous>, transform_indices = @transform_4, window_bounds = array<i64: 10, 1>}, {pipeline_mode = #tpu.pipeline_mode<synchronous>, transform_indices = @transform_5, window_bounds = array<i64: 2, 10>}, {pipeline_mode = #tpu.pipeline_mode<synchronous>, transform_indices = @transform_6, window_bounds = array<i64: 2, 1>}, {transform_indices = @transform_7, window_bounds = array<i64: 2, 16>}]} {
    %c0 = arith.constant 0 : index
    %c0_0 = arith.constant 0 : index
    %0 = vector.load %arg1[%c0, %c0_0] : memref<16x41xf32, #tpu.memory_space<vmem>>, vector<16x41xf32>
    %c0_1 = arith.constant 0 : index
    %c0_2 = arith.constant 0 : index
    %1 = vector.load %arg2[%c0_1, %c0_2] : memref<25x41xf32, #tpu.memory_space<vmem>>, vector<25x41xf32>
    %cst = arith.constant dense<0.000000e+00> : vector<25x16xf32>
    %2 = tpu.matmul %1, %0, %cst {dimension_numbers = #tpu.dot_dimension_numbers<[1], [1], [0], [0], [0, 0, 1, 0], [], []>} : vector<25x41xf32>, vector<16x41xf32>, vector<25x16xf32> -> vector<25x16xf32>
    %c0_3 = arith.constant 0 : index
    %c0_4 = arith.constant 0 : index
    %3 = vector.load %arg3[%c0_3, %c0_4] : memref<25x1xf32, #tpu.memory_space<vmem>>, vector<25x1xf32>
    %4 = vector.broadcast %3 : vector<25x1xf32> to vector<25x16xf32>
    %5 = arith.addf %2, %4 : vector<25x16xf32>
    %cst_5 = arith.constant 0.000000e+00 : f32
    %6 = vector.broadcast %cst_5 : f32 to vector<25x16xf32>
    %7 = arith.maximumf %5, %6 : vector<25x16xf32>
    %c0_6 = arith.constant 0 : index
    %c0_7 = arith.constant 0 : index
    %8 = vector.load %arg4[%c0_6, %c0_7] : memref<10x25xf32, #tpu.memory_space<vmem>>, vector<10x25xf32>
    %cst_8 = arith.constant dense<0.000000e+00> : vector<10x16xf32>
    %9 = tpu.matmul %8, %7, %cst_8 {dimension_numbers = #tpu.dot_dimension_numbers<[1], [0], [0], [1], [0, 0, 1, 1], [], []>} : vector<10x25xf32>, vector<25x16xf32>, vector<10x16xf32> -> vector<10x16xf32>
    %c0_9 = arith.constant 0 : index
    %c0_10 = arith.constant 0 : index
    %10 = vector.load %arg5[%c0_9, %c0_10] : memref<10x1xf32, #tpu.memory_space<vmem>>, vector<10x1xf32>
    %11 = vector.broadcast %10 : vector<10x1xf32> to vector<10x16xf32>
    %12 = arith.addf %9, %11 : vector<10x16xf32>
    %cst_11 = arith.constant 0.000000e+00 : f32
    %13 = vector.broadcast %cst_11 : f32 to vector<10x16xf32>
    %14 = arith.maximumf %12, %13 : vector<10x16xf32>
    %c0_12 = arith.constant 0 : index
    %c0_13 = arith.constant 0 : index
    %15 = vector.load %arg6[%c0_12, %c0_13] : memref<2x10xf32, #tpu.memory_space<vmem>>, vector<2x10xf32>
    %cst_14 = arith.constant dense<0.000000e+00> : vector<2x16xf32>
    %16 = tpu.matmul %15, %14, %cst_14 {dimension_numbers = #tpu.dot_dimension_numbers<[1], [0], [0], [1], [0, 0, 1, 1], [], []>} : vector<2x10xf32>, vector<10x16xf32>, vector<2x16xf32> -> vector<2x16xf32>
    %c0_15 = arith.constant 0 : index
    %c0_16 = arith.constant 0 : index
    %17 = vector.load %arg7[%c0_15, %c0_16] : memref<2x1xf32, #tpu.memory_space<vmem>>, vector<2x1xf32>
    %18 = vector.broadcast %17 : vector<2x1xf32> to vector<2x16xf32>
    %19 = arith.addf %16, %18 : vector<2x16xf32>
    %c0_17 = arith.constant 0 : index
    %c0_18 = arith.constant 0 : index
    %20 = vector.load %arg8[%c0_17, %c0_18] : memref<2x16xf32, #tpu.memory_space<vmem>>, vector<2x16xf32>
    tpu.vector_store %arg8[%c0_17, %c0_18], %19 {strides = array<i32>} : memref<2x16xf32, #tpu.memory_space<vmem>>, vector<2x16xf32>,
    return
  }
  func.func @transform_0(%arg0: i32) -> (i32, i32) {
    %c0_i32 = arith.constant 0 : i32
    %c0_i32_0 = arith.constant 0 : i32
    return %arg0, %c0_i32 : i32, i32
  }
  func.func @transform_1(%arg0: i32) -> (i32, i32) {
    %c0_i32 = arith.constant 0 : i32
    %c0_i32_0 = arith.constant 0 : i32
    %c0_i32_1 = arith.constant 0 : i32
    return %c0_i32, %c0_i32_0 : i32, i32
  }
  func.func @transform_2(%arg0: i32) -> (i32, i32) {
    %c0_i32 = arith.constant 0 : i32
    %c0_i32_0 = arith.constant 0 : i32
    %c0_i32_1 = arith.constant 0 : i32
    return %c0_i32, %c0_i32_0 : i32, i32
  }
  func.func @transform_3(%arg0: i32) -> (i32, i32) {
    %c0_i32 = arith.constant 0 : i32
    %c0_i32_0 = arith.constant 0 : i32
    %c0_i32_1 = arith.constant 0 : i32
    return %c0_i32, %c0_i32_0 : i32, i32
  }
  func.func @transform_4(%arg0: i32) -> (i32, i32) {
    %c0_i32 = arith.constant 0 : i32
    %c0_i32_0 = arith.constant 0 : i32
    %c0_i32_1 = arith.constant 0 : i32
    return %c0_i32, %c0_i32_0 : i32, i32
  }
  func.func @transform_5(%arg0: i32) -> (i32, i32) {
    %c0_i32 = arith.constant 0 : i32
    %c0_i32_0 = arith.constant 0 : i32
    %c0_i32_1 = arith.constant 0 : i32
    return %c0_i32, %c0_i32_0 : i32, i32
  }
  func.func @transform_6(%arg0: i32) -> (i32, i32) {
    %c0_i32 = arith.constant 0 : i32
    %c0_i32_0 = arith.constant 0 : i32
    %c0_i32_1 = arith.constant 0 : i32
    return %c0_i32, %c0_i32_0 : i32, i32
  }
  func.func @transform_7(%arg0: i32) -> (i32, i32) {
    %c0_i32 = arith.constant 0 : i32
    %c0_i32_0 = arith.constant 0 : i32
    return %c0_i32, %arg0 : i32, i32
  }
}

</mosaic_0001>

<bundles_post_ra>
// kernel: mlp_forward.1
= control target key start
LH: loop header
LB: loop body
LE: loop exit
PB: predicated region body
PF: predicated region fallthrough
CT: control target
= control target key end

     0   :  { %vm57_vm0 = vcmask 334848   ;;  %v474_v4 = vmov 0   ;;  %s590_s0 = inlined_call_operand.vmem [shape: f32[16,41], index: 0, kind: input, shape index: {}]   ;;  %s591_s1 = inlined_call_operand.vmem [shape: f32[25,41], index: 1, kind: input, shape index: {}]   ;;  %s592_s2 = inlined_call_operand.vmem [shape: f32[25,1], index: 2, kind: input, shape index: {}]   ;;  %s593_s3 = inlined_call_operand.vmem [shape: f32[10,25], index: 3, kind: input, shape index: {}]   ;;  %s594_s4 = inlined_call_operand.vmem [shape: f32[10,1], index: 4, kind: input, shape index: {}]   ;;  %s595_s5 = inlined_call_operand.vmem [shape: f32[2,10], index: 5, kind: input, shape index: {}]   ;;  %s596_s6 = inlined_call_operand.vmem [shape: f32[2,1], index: 6, kind: input, shape index: {}]   ;;  %s597_s7 = inlined_call_operand.hbm [shape: f32[2,16], index: 7, kind: output, shape index: {}]  }
   0x1   :  { %v27_v0 = vld [vmem:[%s590_s0] sm:$0xff]  ;;  %v28_v1 = vld [vmem:[%s590_s0 + $0x8] sm:$0xff]  ;;  %vm423_vm1 = vmpackc.low %vm57_vm0, %vm57_vm0  ;;  %448 = vset.pattern.permute.xlu0 %v474_v4  ;;  %449 = vset.pattern.permute.xlu1 %v474_v4 }
   0x2   :  { %v29_v2 = vld [vmem:[%s591_s1] sm:$0xff]  ;;  %v422_v3 = vpack.c.bf16 %v28_v1, %v27_v0  ;;  %v35_v6 = vld [vmem:[%s592_s2 + $0x10] sm:$0xff]  ;;  %v34_v7 = vld [vmem:[%s592_s2 + $0x8] sm:$0xff] }
   0x3   :  { %398 = vmatprep.mubr.msk.f32.mxu0 %vm57_vm0, %v29_v2  ;;  %v33_v5 = vld [vmem:[%s592_s2] sm:$0xff]  ;;  %49 = vperm.xlu1 %449, %v35_v6  }
   0x4   :  { %424 = vmatprep.subr.msk.bf16.mxu0 %vm423_vm1, %v422_v3  ;;  %39 = vperm.xlu0 %448, %v33_v5  }
   0x5   :  { %427 = vmatpush3.bf16.xpose.msk.msra.mxu0 %vm423_vm1, %v422_v3 }
   0x6   :  { %12 = vsyncpa [#allocation3], 0  ;;  %v36_v8 = vld [vmem:[%s592_s2 + $0x18] sm:$0x1]  ;;  %v30_v9 = vld [vmem:[%s591_s1 + $0x8] sm:$0xff]  ;;  %vm179_vm2 = vcmask 203776  }
   0x7   :  { %v167_v10 = vld [vmem:[%s594_s4] sm:$0xff]  ;;  %54 = vperm.xlu1 %449, %v36_v8   ;;  %v31_v11 = vld [vmem:[%s591_s1 + $0x10] sm:$0xff]  ;;  %v168_v12 = vld [vmem:[%s594_s4 + $0x8] sm:$0x3]  ;;  %vm186_vm3 = vcmask 1040384   ;;  %vm475_vm4 = vmmov 1  }
   0x8   :  { %44 = vperm.xlu0 %448, %v34_v7   ;;  %v32_v13 = vld [vmem:[%s591_s1 + $0x18] sm:$0x1]  ;;  %v268_v14 = vld [vmem:[%s596_s6] sm:$0x3]  ;;  %vm433_vm5 = vmpackc.low %vm186_vm3, %vm475_vm4  ;;  %v476_v35 = vmov 0.0|0.0   ;;  %vm477_vm6 = vmmov 0  }
   0x9   :  { %v165_v15 = vld [vmem:[%s593_s3] sm:$0xff]  ;;  %v166_v34 = vld [vmem:[%s593_s3 + $0x8] sm:$0x3]  ;;  %v478_v36 = vmov 0.0   ;;  %vm278_vm7 = vcmask 1041408   ;;  %vm274_vm9 = vcmask 80896  }
   0xa   :  { %412 = vmatprep.mubr.msk.f32.mxu1 %vm179_vm2, %v165_v15  ;;  %vm440_vm8 = vmpackc.low %vm278_vm7, %vm475_vm4  ;;  %v267_v46 = vld [vmem:[%s595_s5] sm:$0x3]  ;;  %s479_s27 = smov [#allocation2]   ;;  %vm352_vm10 = vcmask 123904  }
   0xb   :  { %176 = vperm.xlu1 %449, %v168_v12   ;;  %s360_s28 = sshll.u32 %s479_s27, 4  ;;  %s361_s28 = int_to_ptr.vmem [resolvable:$true] %s360_s28 }
   0xc   :  { %399 = vmatmul.mubr.msk.f32.vlgmr.msra.gmra.mrb[0].mxu0 %vm57_vm0, %v30_v9  ;;  %171 = vperm.xlu0 %448, %v167_v10   ;;  %s450_s29 = scalar_lea.vmem %s361_s28, 32  ;;  %p455_p1 = scmp.lt.s32.totalorder %s361_s28, %s361_s28 }
   0xd   :  { %401 = vmatprep.mubr.msk.f32.mxu0 %vm57_vm0, %v31_v11  ;;  %p451_p0 = scmp.ne.s32.totalorder %s361_s28, %s450_s29  ;;  %p456_p2 = scmp.lt.s32.totalorder %s450_s29, %s450_s29 }
   0xf   :  { %p457_p3 = por %p456_p2, %p455_p1 }
  0x10   :  { %402 = vmatmul.mubr.msk.f32.gmra.mrb[2].mxu0 %vm57_vm0, %v32_v13  ;;  %271 = vperm.xlu0 %448, %v268_v14  }
  0x11   :  { %p458_p4 = pnand %p457_p3, %p451_p0 }
  0x82   :  { %v50_v17 = vpop.permute.xlu1 %49 }
  0x83   :  { %v40_v16 = vpop.permute.xlu0 %39 }
  0x86   :  { %v55_v24 = vpop.permute.xlu1 %54 }
  0x87   :  { %v45_v18 = vpop.permute.xlu0 %44 }
  0x8a   :  { %v177_v37 = vpop.permute.xlu1 %176 }
  0x8b   :  { %v172_v39 = vpop.permute.xlu0 %171 }
  0x8f   :  { %v272_v47 = vpop.permute.xlu0 %271 }
  0xdf   :  { %v400_v19 = vpop.f32.mrb[0].mxu0 }
  0xe0   :  { %v148_v20 = vadd.f32 %v400_v19, %v45_v18  ;;  %v142_v21 = vpop.f32.mrb[1].mxu0 }
  0xe1   :  { %v143_v22 = vadd.f32 %v142_v21, %v40_v16 }
  0xe2   :  { %v162_v23 = vmax.f32 %v148_v20, 0.0 }
  0xe3   :  { %v161_v25 = vmax.f32 %v143_v22, 0.0  ;;  %v403_v26 = vpop.f32.mrb[2].mxu0 }
  0xe4   :  { %v158_v27 = vadd.f32 %v403_v26, %v55_v24  ;;  %v152_v28 = vpop.f32.mrb[3].mxu0 }
  0xe5   :  { %v153_v29 = vadd.f32 %v152_v28, %v50_v17  ;;  %v428_v30 = vpack.c.bf16 %v162_v23, %v161_v25 }
  0xe6   :  { %v164_v31 = vmax.f32 %v158_v27, 0.0 }
  0xe7   :  { %v163_v32 = vmax.f32 %v153_v29, 0.0  ;;  %429 = vmatprep.subr.bf16.mxu1 %v428_v30 }
  0xe8   :  { %431 = vmatpush3.bf16.msra.mxu1 %v428_v30 }
  0xe9   :  { %v432_v33 = vpack.c.bf16 %v164_v31, %v163_v32 }
  0xeb   :  { %434 = vmatprep.subr.msk.bf16.mxu1 %vm433_vm5, %v432_v33 }
  0xec   :  { %437 = vmatpush3.bf16.msk.msra.mxu1 %vm433_vm5, %v432_v33 }
  0xed   :  { %438 = vmatprep.subr.bf16.mxu1 %v476_v35 }
  0xef   :  { %413 = vmatmul.mubr.msk.f32.vlgmr.msra.gmra.mrb[0].mxu1 %vm179_vm2, %v166_v34 }
  0xf0   :  { %419 = vmatprep.mubr.msk.f32.mxu1 %vm477_vm6, %v478_v36 }
 0x1c2   :  { %v414_v38 = vpop.f32.mrb[0].mxu1 }
 0x1c3   :  { %v262_v40 = vadd.f32 %v414_v38, %v177_v37  ;;  %v256_v41 = vpop.f32.mrb[1].mxu1 }
 0x1c4   :  { %v257_v42 = vadd.f32 %v256_v41, %v172_v39 }
 0x1c5   :  { %v266_v43 = vmax.f32 %v262_v40, 0.0 }
 0x1c6   :  { %v265_v44 = vmax.f32 %v257_v42, 0.0 }
 0x1c8   :  { %v439_v45 = vpack.c.bf16 %v266_v43, %v265_v44 }
 0x1ca   :  { %441 = vmatpush3.bf16.msk.msra.mxu1 %vm440_vm8, %v439_v45 }
 0x1cd   :  { %420 = vmatmul.mubr.msk.f32.vlgmr.msra.gmra.mrb[2].mxu1 %vm274_vm9, %v267_v46 }
 0x2a0   :  { %v348_v48 = vpop.f32.mrb[2].mxu1 }
 0x2a1   :  { %v349_v49 = vadd.f32 %v348_v48, %v272_v47  ;;  %v421_v50 = vpop.f32.mrb[3].mxu1 }
 0x2a3   :  { %353 = vst.msk [vmem:[#allocation2] sm:$0x3] %vm352_vm10, %v349_v49 }
 0x2a4   :  { %461 = shalt.err (!%p458_p4)
}
 0x2a5   :  { %s462_s8 = scalar_lea.hbm %s597_s7, 32 }
 0x2a6   :  { %p463_p5 = scmp.ne.s32.totalorder %s597_s7, %s462_s8  ;;  %p466_p6 = scmp.lt.u32.totalorder %s462_s8, %s597_s7 }
 0x2a8   :  { %p468_p7 = pnand %p466_p6, %p463_p5 }
 0x2aa   :  { %471 = shalt.err (!%p468_p7)
}
 0x2ab   :  { %363 = dma.vmem_to_hbm [thread:$0]  %s361_s28, 32, %s597_s7, [#allocation3]  }
 0x2ac   :  { %472 = dma.done.wait [#allocation3], 32  }
 0x2ad   :  { %473 = vsyncadd [#allocation3], 4294967264 }
 0x2ae   :  { %367 = vsyncpa [#allocation3], 1 }

</bundles_post_ra>
